<compile_context>
chip_gen: v7x
topology: tpu7x:2x2x1
jax: 0.10.0
libtpu: 0.0.40
codegen_flags: <defaults>
</compile_context>

<pallas_src>
import functools

import jax
import jax.numpy as jnp
import numpy as np
from jax.experimental import pallas as pl
from jax.experimental.pallas import tpu as pltpu

_LANE = 128   # vreg lane width   (last-dim tiling quantum)
_SUB = 8      # vreg sublane rows (second-to-last-dim tiling quantum)


# ----------------------------------------------------------------------------
# VMEM budget / tile selection (host side, runs once per traced shape)
# ----------------------------------------------------------------------------
def _vmem_budget_bytes():
    """~70% of physical per-core VMEM: ~45 MiB on v7x, ~90 MiB on v5e/v6e."""
    try:
        cap = int(pltpu.get_tpu_info().vmem_capacity_bytes)
    except Exception:   # conservative fallback if the query is unavailable
        cap = 64 * 1024 * 1024
    return int(cap * 0.70)


def _lane_divisors_desc(f):
    """Divisors of f that are multiples of 128, descending (f is 128-aligned)."""
    return [d for d in range(f, 0, -_LANE) if f % d == 0]


def _batch_divisors_desc(b):
    """Divisors of b that are multiples of 8 (descending); else just b (full)."""
    if b % _SUB == 0:
        return [d for d in range(b, 0, -_SUB) if b % d == 0]
    return [b]


def _choose_eval_tiles(b, f, itemsize, budget):
    """(tile_b, tile_f) for the streaming normalize kernel."""
    stat_lane_bytes = 2 * 2 * 4                      # mean + inv rows, double-buffered
    choice = None
    for tf in _lane_divisors_desc(f):                # widest lane-dense tile first
        for tb in _batch_divisors_desc(b):           # then tallest batch tile
            per_step = 4 * tb * tf * itemsize + tf * stat_lane_bytes   # x,y 2x-buffered
            if per_step <= budget:
                choice = (tb, tf)
                break
        if choice is not None:
            break
    if choice is None:                               # pathological: smallest legal tile
        choice = (_batch_divisors_desc(b)[-1], _LANE)
    tb, tf = choice
    # v7x has 2 TensorCores: avoid a degenerate 1-step grid for non-trivial sizes.
    if (b // tb) * (f // tf) == 1 and b * f * itemsize >= (256 << 10):
        if b % (2 * _SUB) == 0:
            tb = b // 2
        elif f % (2 * _LANE) == 0:
            tf = f // 2
    return tb, tf


def _choose_update_tile(b, f, itemsize, budget):
    """tile_f for the fused update kernel (full batch per tile), or None if it
    cannot fit even at tf=128 (caller then uses the two-stage path)."""
    stat_lane_bytes = (2 + 4) * 2 * 4                # 2 stat inputs + 4 outputs, 2x-buffered
    fit = None
    for tf in _lane_divisors_desc(f):
        per_step = 4 * b * tf * itemsize + tf * stat_lane_bytes        # x,y 2x-buffered
        if per_step <= budget:
            fit = tf
            break
    if fit is None:
        return None
    # v7x: prefer >=2 feature steps on large F so both TensorCores get work
    # (costs ~0.35us/extra step, negligible at these sizes).
    if fit == f and f >= 1024:
        smaller = [d for d in _lane_divisors_desc(f) if d < f]
        if smaller:
            fit = smaller[0]
    return fit


def _choose_stats_tiles(b, f, itemsize, budget):
    """(tile_b, tile_f) for the batch-reduction stats kernel (large-B fallback)."""
    stat_lane_bytes = (2 + 4) * 2 * 4 + 2 * 4        # stat rows + s1/s2 scratch
    for tf in _lane_divisors_desc(f):
        for tb in _batch_divisors_desc(b):
            per_step = 2 * tb * tf * itemsize + tf * stat_lane_bytes   # x 2x-buffered
            if per_step <= budget:
                return tb, tf
    return _batch_divisors_desc(b)[-1], _LANE


# ----------------------------------------------------------------------------
# Kernels
# ----------------------------------------------------------------------------
def _normalize_kernel(x_ref, mean_ref, inv_ref, y_ref):
    # eval-mode forward: y = (x - mean) * inv, inv = 1/(std + eps) precomputed.
    x = x_ref[...].astype(jnp.float32)
    y_ref[...] = ((x - mean_ref[...]) * inv_ref[...]).astype(y_ref.dtype)


def _update_normalize_kernel(rate_ref, x_ref, mean_ref, var_ref,
                             y_ref, new_mean_ref, new_var_ref,
                             new_std_ref, new_inv_ref, *, eps, inv_b):
    x = x_ref[...].astype(jnp.float32)
    rate = rate_ref[0]

    # One-pass batch statistics: a single sweep of x feeds both moments.
    s1 = jnp.sum(x, axis=0, keepdims=True)
    s2 = jnp.sum(x * x, axis=0, keepdims=True)
    mean_x = s1 * inv_b
    var_x = jnp.maximum(s2 * inv_b - mean_x * mean_x, 0.0)

    mean_old = mean_ref[...]
    var_old = var_ref[...]
    delta = mean_x - mean_old
    new_mean = mean_old + rate * delta
    new_var = var_old + rate * (var_x - var_old + delta * (mean_x - new_mean))
    new_var = jnp.maximum(new_var, 0.0)            # guard fp cancellation -> sqrt(NaN)
    new_std = jnp.sqrt(new_var)
    new_inv = pl.reciprocal(new_std + eps)         # exact: keeps torch-divide parity

    new_mean_ref[...] = new_mean
    new_var_ref[...] = new_var
    new_std_ref[...] = new_std
    new_inv_ref[...] = new_inv
    # forward() normalizes with the *updated* stats (update-then-normalize).
    y_ref[...] = ((x - new_mean) * new_inv).astype(y_ref.dtype)


def _update_stats_kernel(rate_ref, x_ref, mean_ref, var_ref,
                         new_mean_ref, new_var_ref, new_std_ref, new_inv_ref,
                         s1_ref, s2_ref, *, eps, inv_b):
    bstep = pl.program_id(1)

    @pl.when(bstep == 0)
    def _():
        s1_ref[...] = jnp.zeros_like(s1_ref)
        s2_ref[...] = jnp.zeros_like(s2_ref)

    x = x_ref[...].astype(jnp.float32)
    s1_ref[...] += jnp.sum(x, axis=0, keepdims=True)
    s2_ref[...] += jnp.sum(x * x, axis=0, keepdims=True)

    @pl.when(bstep == pl.num_programs(1) - 1)
    def _():
        rate = rate_ref[0]
        mean_x = s1_ref[...] * inv_b
        var_x = jnp.maximum(s2_ref[...] * inv_b - mean_x * mean_x, 0.0)
        mean_old = mean_ref[...]
        var_old = var_ref[...]
        delta = mean_x - mean_old
        new_mean = mean_old + rate * delta
        new_var = jnp.maximum(
            var_old + rate * (var_x - var_old + delta * (mean_x - new_mean)), 0.0)
        new_std = jnp.sqrt(new_var)
        new_mean_ref[...] = new_mean
        new_var_ref[...] = new_var
        new_std_ref[...] = new_std
        new_inv_ref[...] = pl.reciprocal(new_std + eps)


# ----------------------------------------------------------------------------
# pallas_call wrappers (jit-cached per shape/dtype)
# ----------------------------------------------------------------------------
def _normalize_impl(x, mean, inv, budget):
    b, f = x.shape
    tb, tf = _choose_eval_tiles(b, f, x.dtype.itemsize, budget)
    stat_spec = pl.BlockSpec((1, tf), lambda bi, fi: (0, fi))
    return pl.pallas_call(
        _normalize_kernel,
        out_shape=jax.ShapeDtypeStruct((b, f), x.dtype),
        grid=(b // tb, f // tf),
        in_specs=[
            pl.BlockSpec((tb, tf), lambda bi, fi: (bi, fi)),   # x
            stat_spec,                                         # mean
            stat_spec,                                         # 1/(std+eps)
        ],
        out_specs=pl.BlockSpec((tb, tf), lambda bi, fi: (bi, fi)),
        compiler_params=pltpu.CompilerParams(
            dimension_semantics=("parallel", "parallel"),
            vmem_limit_bytes=budget,
        ),
    )(x, mean, inv)


@jax.jit
def _eval_forward(x2d, mean, inv):
    b, f0 = x2d.shape
    fp = mean.shape[1]
    budget = _vmem_budget_bytes()
    if f0 != fp:                                   # pad to lane-dense width
        x2d = jnp.pad(x2d, ((0, 0), (0, fp - f0)))
    y = _normalize_impl(x2d, mean, inv, budget)
    return y[:, :f0]


@functools.partial(jax.jit, static_argnames=("eps", "force_two_stage"))
def _train_forward(count, x2d, mean, var, *, eps, force_two_stage=False):
    b, f0 = x2d.shape
    fp = mean.shape[1]
    budget = _vmem_budget_bytes()
    if f0 != fp:                                   # pad to lane-dense width
        x2d = jnp.pad(x2d, ((0, 0), (0, fp - f0)))

    new_count = count + b                          # device-resident running count
    rate = (b / new_count).astype(jnp.float32)     # (1,) SMEM scalar, no per-step H2D

    itemsize = x2d.dtype.itemsize
    stat = jax.ShapeDtypeStruct((1, fp), jnp.float32)
    tf_fused = _choose_update_tile(b, fp, itemsize, budget)
    use_two_stage = (tf_fused is None or force_two_stage) and b % _SUB == 0

    if not use_two_stage:
        tf = tf_fused if tf_fused is not None else _LANE
        stat_spec = pl.BlockSpec((1, tf), lambda fi: (0, fi))
        y, new_mean, new_var, new_std, new_inv = pl.pallas_call(
            functools.partial(_update_normalize_kernel, eps=eps, inv_b=1.0 / b),
            out_shape=(jax.ShapeDtypeStruct((b, fp), x2d.dtype),
                       stat, stat, stat, stat),
            grid=(fp // tf,),
            in_specs=[
                pl.BlockSpec(memory_space=pltpu.SMEM),          # rate scalar
                pl.BlockSpec((b, tf), lambda fi: (0, fi)),      # x
                stat_spec,                                      # old mean
                stat_spec,                                      # old var
            ],
            out_specs=(pl.BlockSpec((b, tf), lambda fi: (0, fi)),
                       stat_spec, stat_spec, stat_spec, stat_spec),
            compiler_params=pltpu.CompilerParams(
                dimension_semantics=("parallel",),
                vmem_limit_bytes=budget,
            ),
        )(rate, x2d, mean, var)
    else:
        # Large-batch fallback: batch-reduction stats kernel + streaming normalize.
        tb, tf = _choose_stats_tiles(b, fp, itemsize, budget)
        if force_two_stage and b % _SUB == 0 and b > _SUB:
            tb = _SUB                              # exercise multi-step reduction in tests
        stat_spec = pl.BlockSpec((1, tf), lambda fi, bi: (0, fi))
        new_mean, new_var, new_std, new_inv = pl.pallas_call(
            functools.partial(_update_stats_kernel, eps=eps, inv_b=1.0 / b),
            out_shape=(stat, stat, stat, stat),
            grid=(fp // tf, b // tb),              # batch reduction axis last
            in_specs=[
                pl.BlockSpec(memory_space=pltpu.SMEM),            # rate scalar
                pl.BlockSpec((tb, tf), lambda fi, bi: (bi, fi)),  # x
                stat_spec,                                        # old mean
                stat_spec,                                        # old var
            ],
            out_specs=(stat_spec, stat_spec, stat_spec, stat_spec),
            scratch_shapes=[pltpu.VMEM((1, tf), jnp.float32),     # sum(x)
                            pltpu.VMEM((1, tf), jnp.float32)],    # sum(x*x)
            compiler_params=pltpu.CompilerParams(
                dimension_semantics=("parallel", "arbitrary"),
                vmem_limit_bytes=budget,
            ),
        )(rate, x2d, mean, var)
        y = _normalize_impl(x2d, new_mean, new_inv, budget)

    return y[:, :f0], new_mean, new_var, new_std, new_inv, new_count


# ----------------------------------------------------------------------------
# Module-like wrapper mirroring the PyTorch class
# ----------------------------------------------------------------------------
class EmpiricalNormalization:
    """Normalize mean and variance of values based on empirical values."""

    def __init__(self, shape, eps=0.01, until=None):
        if isinstance(shape, int):
            shape = (shape,)
        self.shape = tuple(shape)
        self._feat = int(np.prod(self.shape))
        self._feat_pad = ((self._feat + _LANE - 1) // _LANE) * _LANE
        self.eps = float(eps)
        self.until = until
        fp = self._feat_pad
        # Buffers (flattened, lane-padded feature axis); padded columns are inert.
        self._mean = jnp.zeros((1, fp), jnp.float32)
        self._var = jnp.ones((1, fp), jnp.float32)
        self._std = jnp.ones((1, fp), jnp.float32)
        self._inv = jnp.full((1, fp), 1.0 / (1.0 + self.eps), jnp.float32)
        self._count_dev = jnp.zeros((1,), jnp.float32)   # device count (feeds rate)
        # TODO(synk): host-side count/until bookkeeping stays in Python, mirroring
        # the plain-int `count` attribute of the torch module.
        self.count = 0
        self.training = True

    @property
    def mean(self):
        return self._mean[0, : self._feat].reshape(self.shape)

    @property
    def std(self):
        return self._std[0, : self._feat].reshape(self.shape)

    def forward(self, x):
        b = x.shape[0]
        x2d = x.reshape(b, self._feat)   # native dtype; widening happens in-kernel
        if self.training and not (self.until is not None and self.count >= self.until):
            self.count += b
            (y, self._mean, self._var, self._std, self._inv,
             self._count_dev) = _train_forward(
                 self._count_dev, x2d, self._mean, self._var, eps=self.eps)
        else:
            y = _eval_forward(x2d, self._mean, self._inv)
        return y.reshape(x.shape)

    __call__ = forward

    def inverse(self, y):
        b = y.shape[0]
        y2d = y.reshape(b, self._feat).astype(jnp.float32)
        std = self._std[:, : self._feat]
        mean = self._mean[:, : self._feat]
        return (y2d * (std + self.eps) + mean).reshape(y.shape)


# ----------------------------------------------------------------------------
# Pure-JAX reference (for correctness checks)
# ----------------------------------------------------------------------------
def _ref_train_forward(x2d, mean, var, count, eps):
    b = x2d.shape[0]
    new_count = count + b
    rate = b / new_count
    mean_x = jnp.mean(x2d, axis=0, keepdims=True)
    var_x = jnp.mean((x2d - mean_x) ** 2, axis=0, keepdims=True)
    delta = mean_x - mean
    new_mean = mean + rate * delta
    new_var = var + rate * (var_x - var + delta * (mean_x - new_mean))
    new_std = jnp.sqrt(new_var)
    return (x2d - new_mean) / (new_std + eps), new_mean, new_var, new_std


if __name__ == "__main__":
    key = jax.random.PRNGKey(0)
    k0, k1, k2 = jax.random.split(key, 3)

    # ---- 1) training-mode forward, multi-dim feature shape (F = 3*128 = 384) ----
    batch, feat_shape = 8, (3, 128)
    x = jax.random.normal(k0, (batch,) + feat_shape, jnp.float32) * 2.0 + 1.0

    norm = EmpiricalNormalization(feat_shape, eps=0.01, until=None)
    x2d = x.reshape(batch, -1)
    y_ref, m_ref, v_ref, s_ref = _ref_train_forward(
        x2d, norm._mean, norm._var, norm.count, norm.eps)

    y = norm(x)                                   # fused update + normalize kernel
    jax.block_until_ready(y)
    np.testing.assert_allclose(np.asarray(y).reshape(batch, -1), np.asarray(y_ref),
                               atol=1e-5, rtol=1e-5)
    np.testing.assert_allclose(np.asarray(norm._mean), np.asarray(m_ref),
                               atol=1e-5, rtol=1e-5)
    np.testing.assert_allclose(np.asarray(norm._std), np.asarray(s_ref),
                               atol=1e-5, rtol=1e-5)

    # ---- 2) eval-mode forward (batch x feature tiled streaming kernel) ----
    norm.training = False
    y_eval = norm(x)
    jax.block_until_ready(y_eval)
    y_eval_ref = (x2d - norm._mean) / (norm._std + norm.eps)
    np.testing.assert_allclose(np.asarray(y_eval).reshape(batch, -1),
                               np.asarray(y_eval_ref), atol=1e-5, rtol=1e-5)

    # ---- 3) non-128 feature dim (padded to 128), bf16 I/O, `until` gating ----
    norm_small = EmpiricalNormalization(32, eps=0.01, until=16)
    xb = (jax.random.normal(k1, (8, 32), jnp.float32) * 0.5).astype(jnp.bfloat16)
    y0 = norm_small(xb)                           # count -> 8  (update)
    yb_ref, _, _, _ = _ref_train_forward(
        xb.astype(jnp.float32),
        jnp.zeros((1, 32), jnp.float32), jnp.ones((1, 32), jnp.float32), 0, 0.01)
    np.testing.assert_allclose(np.asarray(y0.astype(jnp.float32)), np.asarray(yb_ref),
                               atol=0.03, rtol=0.03)
    y1 = norm_small(xb)                           # count -> 16 (update)
    y2 = norm_small(xb)                           # until reached -> eval kernel only
    jax.block_until_ready((y1, y2))
    assert y2.shape == xb.shape and y2.dtype == xb.dtype

    # ---- 4) two-stage (batch-reduction) update path, forced at small shapes ----
    xs = jax.random.normal(k2, (64, 256), jnp.float32) * 1.5 - 0.5
    y2s, m2s, v2s, s2s, i2s, c2s = _train_forward(
        jnp.zeros((1,), jnp.float32), xs,
        jnp.zeros((1, 256), jnp.float32), jnp.ones((1, 256), jnp.float32),
        eps=0.01, force_two_stage=True)
    jax.block_until_ready(y2s)
    ys_ref, ms_ref, vs_ref, ss_ref = _ref_train_forward(
        xs, jnp.zeros((1, 256), jnp.float32), jnp.ones((1, 256), jnp.float32), 0, 0.01)
    np.testing.assert_allclose(np.asarray(y2s), np.asarray(ys_ref), atol=1e-4, rtol=1e-4)
    np.testing.assert_allclose(np.asarray(m2s), np.asarray(ms_ref), atol=1e-4, rtol=1e-4)
    np.testing.assert_allclose(np.asarray(s2s), np.asarray(ss_ref), atol=1e-4, rtol=1e-4)

    print("KERNEL_OK")
</pallas_src>

<mosaic_0001>
module attributes {stable_mosaic.version = 11 : i64} {
  func.func @_update_normalize_kernel(%arg0: i32, %arg1: memref<1xf32, #tpu.memory_space<smem>>, %arg2: memref<8x384xf32, #tpu.memory_space<vmem>>, %arg3: memref<1x384xf32, #tpu.memory_space<vmem>>, %arg4: memref<1x384xf32, #tpu.memory_space<vmem>>, %arg5: memref<8x384xf32, #tpu.memory_space<vmem>>, %arg6: memref<1x384xf32, #tpu.memory_space<vmem>>, %arg7: memref<1x384xf32, #tpu.memory_space<vmem>>, %arg8: memref<1x384xf32, #tpu.memory_space<vmem>>, %arg9: memref<1x384xf32, #tpu.memory_space<vmem>>) attributes {dimension_semantics = [#tpu.dimension_semantics<parallel>], iteration_bounds = array<i64: 1>, scalar_prefetch = 0 : i64, scratch_operands = 0 : i64, tpu.core_type = #tpu.core_type<tc>, window_params = [{transform_indices = @transform_0, window_bounds = array<i64: 1>}, {transform_indices = @transform_1, window_bounds = array<i64: 8, 384>}, {transform_indices = @transform_2, window_bounds = array<i64: 1, 384>}, {transform_indices = @transform_3, window_bounds = array<i64: 1, 384>}, {transform_indices = @transform_4, window_bounds = array<i64: 8, 384>}, {transform_indices = @transform_5, window_bounds = array<i64: 1, 384>}, {transform_indices = @transform_6, window_bounds = array<i64: 1, 384>}, {transform_indices = @transform_7, window_bounds = array<i64: 1, 384>}, {transform_indices = @transform_8, window_bounds = array<i64: 1, 384>}]} {
    %c0 = arith.constant 0 : index
    %c0_0 = arith.constant 0 : index
    %0 = vector.load %arg2[%c0, %c0_0] : memref<8x384xf32, #tpu.memory_space<vmem>>, vector<8x384xf32>
    %c0_1 = arith.constant 0 : index
    %1 = memref.load %arg1[%c0_1] : memref<1xf32, #tpu.memory_space<smem>>
    %cst = arith.constant dense<0.000000e+00> : vector<384xf32>
    %2 = vector.multi_reduction <add>, %0, %cst [0] : vector<8x384xf32> to vector<384xf32>
    %3 = vector.shape_cast %2 : vector<384xf32> to vector<1x384xf32>
    %4 = arith.mulf %0, %0 : vector<8x384xf32>
    %cst_2 = arith.constant dense<0.000000e+00> : vector<384xf32>
    %5 = vector.multi_reduction <add>, %4, %cst_2 [0] : vector<8x384xf32> to vector<384xf32>
    %6 = vector.shape_cast %5 : vector<384xf32> to vector<1x384xf32>
    %cst_3 = arith.constant 1.250000e-01 : f32
    %7 = vector.broadcast %cst_3 : f32 to vector<1x384xf32>
    %8 = arith.mulf %3, %7 : vector<1x384xf32>
    %cst_4 = arith.constant 1.250000e-01 : f32
    %9 = vector.broadcast %cst_4 : f32 to vector<1x384xf32>
    %10 = arith.mulf %6, %9 : vector<1x384xf32>
    %11 = arith.mulf %8, %8 : vector<1x384xf32>
    %12 = arith.subf %10, %11 : vector<1x384xf32>
    %cst_5 = arith.constant 0.000000e+00 : f32
    %13 = vector.broadcast %cst_5 : f32 to vector<1x384xf32>
    %14 = arith.maximumf %12, %13 : vector<1x384xf32>
    %c0_6 = arith.constant 0 : index
    %c0_7 = arith.constant 0 : index
    %15 = vector.load %arg3[%c0_6, %c0_7] : memref<1x384xf32, #tpu.memory_space<vmem>>, vector<1x384xf32>
    %c0_8 = arith.constant 0 : index
    %c0_9 = arith.constant 0 : index
    %16 = vector.load %arg4[%c0_8, %c0_9] : memref<1x384xf32, #tpu.memory_space<vmem>>, vector<1x384xf32>
    %17 = arith.subf %8, %15 : vector<1x384xf32>
    %18 = vector.broadcast %1 : f32 to vector<1x384xf32>
    %19 = arith.mulf %18, %17 : vector<1x384xf32>
    %20 = arith.addf %15, %19 : vector<1x384xf32>
    %21 = arith.subf %14, %16 : vector<1x384xf32>
    %22 = arith.subf %8, %20 : vector<1x384xf32>
    %23 = arith.mulf %17, %22 : vector<1x384xf32>
    %24 = arith.addf %21, %23 : vector<1x384xf32>
    %25 = vector.broadcast %1 : f32 to vector<1x384xf32>
    %26 = arith.mulf %25, %24 : vector<1x384xf32>
    %27 = arith.addf %16, %26 : vector<1x384xf32>
    %cst_10 = arith.constant 0.000000e+00 : f32
    %28 = vector.broadcast %cst_10 : f32 to vector<1x384xf32>
    %29 = arith.maximumf %27, %28 : vector<1x384xf32>
    %30 = math.sqrt %29 : vector<1x384xf32>
    %cst_11 = arith.constant 0.00999999977 : f32
    %31 = vector.broadcast %cst_11 : f32 to vector<1x384xf32>
    %32 = arith.addf %30, %31 : vector<1x384xf32>
    %33 = tpu.reciprocal %32 : vector<1x384xf32> -> vector<1x384xf32>
    %c0_12 = arith.constant 0 : index
    %c0_13 = arith.constant 0 : index
    %34 = vector.load %arg6[%c0_12, %c0_13] : memref<1x384xf32, #tpu.memory_space<vmem>>, vector<1x384xf32>
    tpu.vector_store %arg6[%c0_12, %c0_13], %20 {strides = array<i32>} : memref<1x384xf32, #tpu.memory_space<vmem>>, vector<1x384xf32>,
    %c0_14 = arith.constant 0 : index
    %c0_15 = arith.constant 0 : index
    %35 = vector.load %arg7[%c0_14, %c0_15] : memref<1x384xf32, #tpu.memory_space<vmem>>, vector<1x384xf32>
    tpu.vector_store %arg7[%c0_14, %c0_15], %29 {strides = array<i32>} : memref<1x384xf32, #tpu.memory_space<vmem>>, vector<1x384xf32>,
    %c0_16 = arith.constant 0 : index
    %c0_17 = arith.constant 0 : index
    %36 = vector.load %arg8[%c0_16, %c0_17] : memref<1x384xf32, #tpu.memory_space<vmem>>, vector<1x384xf32>
    tpu.vector_store %arg8[%c0_16, %c0_17], %30 {strides = array<i32>} : memref<1x384xf32, #tpu.memory_space<vmem>>, vector<1x384xf32>,
    %c0_18 = arith.constant 0 : index
    %c0_19 = arith.constant 0 : index
    %37 = vector.load %arg9[%c0_18, %c0_19] : memref<1x384xf32, #tpu.memory_space<vmem>>, vector<1x384xf32>
    tpu.vector_store %arg9[%c0_18, %c0_19], %33 {strides = array<i32>} : memref<1x384xf32, #tpu.memory_space<vmem>>, vector<1x384xf32>,
    %38 = vector.broadcast %20 : vector<1x384xf32> to vector<8x384xf32>
    %39 = arith.subf %0, %38 : vector<8x384xf32>
    %40 = vector.broadcast %33 : vector<1x384xf32> to vector<8x384xf32>
    %41 = arith.mulf %39, %40 : vector<8x384xf32>
    %c0_20 = arith.constant 0 : index
    %c0_21 = arith.constant 0 : index
    %42 = vector.load %arg5[%c0_20, %c0_21] : memref<8x384xf32, #tpu.memory_space<vmem>>, vector<8x384xf32>
    tpu.vector_store %arg5[%c0_20, %c0_21], %41 {strides = array<i32>} : memref<8x384xf32, #tpu.memory_space<vmem>>, vector<8x384xf32>,
    return
  }
  func.func @transform_0(%arg0: i32) -> i32 {
    %c0_i32 = arith.constant 0 : i32
    %c0_i32_0 = arith.constant 0 : i32
    return %c0_i32 : i32
  }
  func.func @transform_1(%arg0: i32) -> (i32, i32) {
    %c0_i32 = arith.constant 0 : i32
    %c0_i32_0 = arith.constant 0 : i32
    return %c0_i32, %arg0 : i32, i32
  }
  func.func @transform_2(%arg0: i32) -> (i32, i32) {
    %c0_i32 = arith.constant 0 : i32
    %c0_i32_0 = arith.constant 0 : i32
    return %c0_i32, %arg0 : i32, i32
  }
  func.func @transform_3(%arg0: i32) -> (i32, i32) {
    %c0_i32 = arith.constant 0 : i32
    %c0_i32_0 = arith.constant 0 : i32
    return %c0_i32, %arg0 : i32, i32
  }
  func.func @transform_4(%arg0: i32) -> (i32, i32) {
    %c0_i32 = arith.constant 0 : i32
    %c0_i32_0 = arith.constant 0 : i32
    return %c0_i32, %arg0 : i32, i32
  }
  func.func @transform_5(%arg0: i32) -> (i32, i32) {
    %c0_i32 = arith.constant 0 : i32
    %c0_i32_0 = arith.constant 0 : i32
    return %c0_i32, %arg0 : i32, i32
  }
  func.func @transform_6(%arg0: i32) -> (i32, i32) {
    %c0_i32 = arith.constant 0 : i32
    %c0_i32_0 = arith.constant 0 : i32
    return %c0_i32, %arg0 : i32, i32
  }
  func.func @transform_7(%arg0: i32) -> (i32, i32) {
    %c0_i32 = arith.constant 0 : i32
    %c0_i32_0 = arith.constant 0 : i32
    return %c0_i32, %arg0 : i32, i32
  }
  func.func @transform_8(%arg0: i32) -> (i32, i32) {
    %c0_i32 = arith.constant 0 : i32
    %c0_i32_0 = arith.constant 0 : i32
    return %c0_i32, %arg0 : i32, i32
  }
}

</mosaic_0001>

<bundles_post_ra>
// kernel: _train_forward.1
= control target key start
LH: loop header
LB: loop body
LE: loop exit
PB: predicated region body
PF: predicated region fallthrough
CT: control target
= control target key end

     0   :  { %15 = vsyncpa [#allocation4], 0  ;;  %s719_s0 = inlined_call_operand.<no memory space> [shape: f32[1], index: 0, kind: input, shape index: {}]   ;;  %s720_s1 = inlined_call_operand.hbm [shape: f32[8,384], index: 1, kind: input, shape index: {}]   ;;  %s721_s2 = inlined_call_operand.vmem [shape: f32[1,384], index: 2, kind: input, shape index: {}]   ;;  %s722_s3 = inlined_call_operand.vmem [shape: f32[1,384], index: 3, kind: input, shape index: {}]   ;;  %s723_s4 = inlined_call_operand.hbm [shape: f32[8,384], index: 4, kind: output, shape index: {0}]   ;;  %s724_s5 = inlined_call_operand.hbm [shape: f32[1,384], index: 5, kind: output, shape index: {1}]   ;;  %s725_s6 = inlined_call_operand.hbm [shape: f32[1,384], index: 6, kind: output, shape index: {2}]   ;;  %s726_s7 = inlined_call_operand.hbm [shape: f32[1,384], index: 7, kind: output, shape index: {3}]   ;;  %s727_s8 = inlined_call_operand.hbm [shape: f32[1,384], index: 8, kind: output, shape index: {4}]  }
   0x1   :  { %16 = vsyncpa [#allocation5], 0 }
   0x2   :  { %17 = vsyncpa [#allocation8], 0 }
   0x3   :  { %18 = vsyncpa [#allocation11], 0  ;;  %s487_s27 = smov [#allocation3]   ;;  %s347_s9 = scalar_lea.hbm %s720_s1, 384 }
   0x4   :  { %s27_s28 = sshll.u32 %s487_s27, 4  ;;  %p348_p0 = scmp.ne.s32.totalorder %s720_s1, %s347_s9  ;;  %s28_s28 = int_to_ptr.vmem [resolvable:$true] %s27_s28 }
   0x5   :  { %p351_p1 = scmp.lt.u32.totalorder %s347_s9, %s720_s1 }
   0x7   :  { %p353_p2 = pnand %p351_p1, %p348_p0 }
   0x9   :  { %356 = shalt.err (!%p353_p2)
}
   0xa   :  { %s357_s14 = scalar_lea.vmem %s28_s28, 384  ;;  %p362_p4 = scmp.lt.s32.totalorder %s28_s28, %s28_s28 }
   0xb   :  { %p358_p3 = scmp.ne.s32.totalorder %s28_s28, %s357_s14  ;;  %p363_p5 = scmp.lt.s32.totalorder %s357_s14, %s357_s14 }
   0xd   :  { %p364_p6 = por %p363_p5, %p362_p4 }
   0xf   :  { %p365_p7 = pnand %p364_p6, %p358_p3 }
  0x11   :  { %368 = shalt.err (!%p365_p7)
}
  0x12   :  { %30 = dma.hbm_to_vmem [thread:$0]  %s720_s1, 384, %s28_s28, [#allocation4]  }
  0x13   :  { %479 = dma.done.wait [#allocation4], 384  }
  0x14   :  { %480 = vsyncadd [#allocation4], 4294966912  ;;  %v99_v0 = vlaneseq  ;;  %v551_v1 = vld [vmem:[#allocation3] sm:$0xff]  ;;  %v553_v2 = vld [vmem:[#allocation3 + $0x8] sm:$0xff]  ;;  %v488_v24 = vmov 1966171168   ;;  %v591_v56 = vstv %s719_s0 }
  0x15   :  { %v555_v3 = vld [vmem:[#allocation3 + $0x10] sm:$0xff]  ;;  %v42_v4 = vrot.slane %v551_v1, 4  ;;  %v48_v5 = vrot.slane %v553_v2, 4  ;;  %v60_v7 = vmul.f32 %v551_v1, %v551_v1  ;;  %v61_v8 = vmul.f32 %v553_v2, %v553_v2  ;;  %v96_v38 = vld [vmem:[%s721_s2] sm:$0x7]  ;;  %s489_s20 = smov [#allocation7]  }
  0x16   :  { %v54_v6 = vrot.slane %v555_v3, 4  ;;  %v62_v9 = vmul.f32 %v555_v3, %v555_v3  ;;  %v100_v10 = vshrl.u32 %v99_v0, 7  ;;  %v126_v25 = vunpack.c.l.s4 %v488_v24  ;;  %s283_s21 = sshll.u32 %s489_s20, 4  ;;  %s284_s21 = int_to_ptr.vmem [resolvable:$true] %s283_s21 }
  0x17   :  { %v43_v11 = vadd.f32 %v42_v4, %v551_v1  ;;  %v49_v12 = vadd.f32 %v48_v5, %v553_v2  ;;  %v63_v14 = vrot.slane %v60_v7, 4  ;;  %v69_v15 = vrot.slane %v61_v8, 4  ;;  %s373_s22 = scalar_lea.vmem %s284_s21, 64  ;;  %p374_p9 = scmp.lt.s32.totalorder %s284_s21, %s284_s21 }
  0x18   :  { %v55_v13 = vadd.f32 %v54_v6, %v555_v3  ;;  %v75_v16 = vrot.slane %v62_v9, 4  ;;  %v570_v23 = vsub.s32 0, %v100_v10  ;;  %v572_v32 = vsub.s32 1, %v100_v10 }
  0x19   :  { %v44_v17 = vrot.slane %v43_v11, 2  ;;  %v50_v18 = vrot.slane %v49_v12, 2  ;;  %v64_v20 = vadd.f32 %v63_v14, %v60_v7  ;;  %v70_v21 = vadd.f32 %v69_v15, %v61_v8 }
  0x1a   :  { %v56_v19 = vrot.slane %v55_v13, 2  ;;  %v76_v22 = vadd.f32 %v75_v16, %v62_v9  ;;  %v574_v33 = vsub.s32 2, %v100_v10  ;;  %v127_v41 = vunpack.c.0.s8 %v126_v25 }
  0x1b   :  { %v45_v26 = vadd.f32 %v44_v17, %v43_v11  ;;  %v51_v27 = vadd.f32 %v50_v18, %v49_v12  ;;  %v65_v29 = vrot.slane %v64_v20, 2  ;;  %v71_v30 = vrot.slane %v70_v21, 2  ;;  %v97_v17 = vld [vmem:[%s722_s3] sm:$0x7]  ;;  %s369_s3 = scalar_lea.vmem %s284_s21, 48 }
  0x1c   :  { %v57_v28 = vadd.f32 %v56_v19, %v55_v13  ;;  %v77_v31 = vrot.slane %v76_v22, 2  ;;  %v102_v48 = vrot.slane %v96_v38, %v570_v23  ;;  %v106_v49 = vrot.slane %v96_v38, %v572_v32  ;;  %p370_p8 = scmp.ne.s32.totalorder %s284_s21, %s369_s3  ;;  %p375_p10 = scmp.lt.s32.totalorder %s373_s22, %s369_s3 }
  0x1d   :  { %v46_v34 = vrot.slane %v45_v26, 1  ;;  %v52_v35 = vrot.slane %v51_v27, 1  ;;  %v66_v37 = vadd.f32 %v65_v29, %v64_v20  ;;  %v72_v39 = vadd.f32 %v71_v30, %v70_v21 }
  0x1e   :  { %v58_v36 = vrot.slane %v57_v28, 1  ;;  %v78_v40 = vadd.f32 %v77_v31, %v76_v22  ;;  %v110_v53 = vrot.slane %v96_v38, %v574_v33  ;;  %v596_v61 = vsub.s32 %v127_v41, %v100_v10  ;;  %p376_p11 = por %p375_p10, %p374_p9 }
  0x1f   :  { %v47_v42 = vadd.f32 %v46_v34, %v45_v26  ;;  %v53_v43 = vadd.f32 %v52_v35, %v51_v27  ;;  %v67_v45 = vrot.slane %v66_v37, 1  ;;  %v73_v46 = vrot.slane %v72_v39, 1 }
  0x20   :  { %v59_v44 = vadd.f32 %v58_v36, %v57_v28  ;;  %v79_v47 = vrot.slane %v78_v40, 1  ;;  %vm614_vm0 = vcmp.lt.s32.totalorder %v99_v0, 384  ;;  %v153_v24 = vrot.slane %v97_v17, %v570_v23  ;;  %p377_p12 = pnand %p376_p11, %p370_p8 }
  0x21   :  { %v581_v50 = vmul.f32 0.125, %v47_v42  ;;  %v583_v51 = vmul.f32 0.125, %v53_v43  ;;  %v68_v54 = vadd.f32 %v67_v45, %v66_v37  ;;  %v74_v55 = vadd.f32 %v73_v46, %v72_v39 }
  0x22   :  { %v585_v52 = vmul.f32 0.125, %v59_v44  ;;  %v80_v57 = vadd.f32 %v79_v47, %v78_v40  ;;  %v157_v25 = vrot.slane %v97_v17, %v572_v32  ;;  %v161_v28 = vrot.slane %v97_v17, %v574_v33 }
  0x23   :  { %v114_v58 = vsub.f32 %v581_v50, %v102_v48  ;;  %v115_v59 = vsub.f32 %v583_v51, %v106_v49  ;;  %v84_v62 = vmul.f32 0.125, %v68_v54  ;;  %v85_v5 = vmul.f32 0.125, %v74_v55 }
  0x24   :  { %v116_v60 = vsub.f32 %v585_v52, %v110_v53  ;;  %v87_v6 = vmul.f32 %v581_v50, %v581_v50  ;;  %v88_v7 = vmul.f32 %v583_v51, %v583_v51  ;;  %v86_v9 = vmul.f32 0.125, %v80_v57 }
  0x25   :  { %v118_v63 = vmul.f32 %v591_v56, %v114_v58  ;;  %v119_v4 = vmul.f32 %v591_v56, %v115_v59  ;;  %v89_v11 = vmul.f32 %v585_v52, %v585_v52 }
  0x26   :  { %v120_v8 = vmul.f32 %v591_v56, %v116_v60  ;;  %v90_v14 = vsub.f32 %v84_v62, %v87_v6  ;;  %v91_v15 = vsub.f32 %v85_v5, %v88_v7 }
  0x27   :  { %v124_v10 = vcombine.low %v118_v63, %v119_v4  ;;  %v92_v16 = vsub.f32 %v86_v9, %v89_v11 }
  0x28   :  { %v138_v12 = vrot.slane %v120_v8, %v596_v61  ;;  %v93_v21 = vmax.f32 %v90_v14, 0.0  ;;  %v94_v22 = vmax.f32 %v91_v15, 0.0 }
  0x29   :  { %v131_v13 = vrot.slane %v124_v10, %v596_v61  ;;  %v95_v26 = vmax.f32 %v92_v16, 0.0 }
  0x2a   :  { %v165_v31 = vsub.f32 %v93_v21, %v153_v24  ;;  %v166_v34 = vsub.f32 %v94_v22, %v157_v25 }
  0x2b   :  { %v139_v18 = vcombine.low %v131_v13, %v138_v12 }
  0x2d   :  { %v146_v19 = vrot.slane %v139_v18, %v596_v61 }
  0x2f   :  { %v148_v27 = vadd.f32 %v146_v19, %v96_v38 }
  0x31   :  { %v622_v29 = vrot.slane %v148_v27, %v570_v23  ;;  %v625_v30 = vrot.slane %v148_v27, %v572_v32  ;;  %v628_v0 = vrot.slane %v148_v27, %v574_v33  ;;  %238 = vst.msk [vmem:[#allocation7] sm:$0x7] %vm614_vm0, %v148_v27 }
  0x32   :  { %380 = shalt.err (!%p377_p12)
}
  0x33   :  { %s381_s25 = scalar_lea.hbm %s724_s5, 48 }
  0x34   :  { %p382_p13 = scmp.ne.s32.totalorder %s724_s5, %s381_s25  ;;  %p385_p0 = scmp.lt.u32.totalorder %s381_s25, %s724_s5 }
  0x36   :  { %p387_p1 = pnand %p385_p0, %p382_p13 }
  0x38   :  { %390 = shalt.err (!%p387_p1)
}
  0x39   :  { %286 = dma.vmem_to_hbm [thread:$0]  %s284_s21, 48, %s724_s5, [#allocation8]   ;;  %v167_v35 = vsub.f32 %v95_v26, %v161_v28  ;;  %v184_v36 = vsub.f32 %v581_v50, %v622_v29  ;;  %v185_v37 = vsub.f32 %v583_v51, %v625_v30  ;;  %v186_v38 = vsub.f32 %v585_v52, %v628_v0 }
  0x3a   :  { %s490_s5 = smov [#allocation9]  }
  0x3b   :  { %v187_v39 = vmul.f32 %v184_v36, %v114_v58  ;;  %v188_v40 = vmul.f32 %v185_v37, %v115_v59  ;;  %v189_v41 = vmul.f32 %v186_v38, %v116_v60  ;;  %s293_s10 = sshll.u32 %s490_s5, 4  ;;  %s294_s10 = int_to_ptr.vmem [resolvable:$true] %s293_s10 }
  0x3c   :  { %s391_s11 = scalar_lea.vmem %s294_s10, 48  ;;  %s395_s12 = scalar_lea.vmem %s294_s10, 64 }
  0x3d   :  { %v190_v42 = vadd.f32 %v187_v39, %v165_v31  ;;  %v191_v43 = vadd.f32 %v188_v40, %v166_v34  ;;  %v192_v44 = vadd.f32 %v189_v41, %v167_v35  ;;  %p392_p2 = scmp.ne.s32.totalorder %s294_s10, %s391_s11  ;;  %p396_p3 = scmp.lt.s32.totalorder %s294_s10, %s294_s10 }
  0x3e   :  { %p397_p4 = scmp.lt.s32.totalorder %s395_s12, %s391_s11 }
  0x3f   :  { %v193_v45 = vmul.f32 %v190_v42, %v591_v56  ;;  %v194_v46 = vmul.f32 %v191_v43, %v591_v56  ;;  %v195_v47 = vmul.f32 %v192_v44, %v591_v56 }
  0x40   :  { %p398_p5 = por %p397_p4, %p396_p3 }
  0x41   :  { %v199_v48 = vcombine.low %v193_v45, %v194_v46  ;;  %v213_v49 = vrot.slane %v195_v47, %v596_v61 }
  0x42   :  { %p399_p6 = pnand %p398_p5, %p392_p2 }
  0x43   :  { %v206_v50 = vrot.slane %v199_v48, %v596_v61 }
  0x45   :  { %v214_v51 = vcombine.low %v206_v50, %v213_v49 }
  0x47   :  { %v221_v52 = vrot.slane %v214_v51, %v596_v61 }
  0x49   :  { %v223_v53 = vadd.f32 %v221_v52, %v97_v17 }
  0x4b   :  { %v224_v54 = vmax.f32 %v223_v53, 0.0 }
  0x4d   :  { %343 = vrsqrt.f32 %v224_v54  ;;  %239 = vst.msk [vmem:[#allocation9] sm:$0x7] %vm614_vm0, %v224_v54 }
  0x4e   :  { %402 = shalt.err (!%p399_p6)
}
  0x4f   :  { %s403_s15 = scalar_lea.hbm %s725_s6, 48 }
  0x50   :  { %p404_p7 = scmp.ne.s32.totalorder %s725_s6, %s403_s15  ;;  %p407_p8 = scmp.lt.u32.totalorder %s403_s15, %s725_s6 }
  0x52   :  { %p409_p9 = pnand %p407_p8, %p404_p7 }
  0x54   :  { %412 = shalt.err (!%p409_p9)
}
  0x55   :  { %296 = dma.vmem_to_hbm [thread:$0]  %s294_s10, 48, %s725_s6, [#allocation8]   ;;  %vm227_vm1 = vcmp.eq.f32.partialorder %v224_v54, inf  ;;  %v230_v56 = vand.u32 2147483648, %v224_v54  ;;  %vm229_vm2 = vcmp.eq.f32.partialorder %v224_v54, 0.0 }
  0x56   :  { %s491_s19 = smov [#allocation10]  }
  0x57   :  { %v344_v55 = vpop.eup %343  ;;  %s303_s20 = sshll.u32 %s491_s19, 4  ;;  %s304_s20 = int_to_ptr.vmem [resolvable:$true] %s303_s20 }
  0x58   :  { %v226_v57 = vmul.f32 %v344_v55, %v224_v54  ;;  %s413_s21 = scalar_lea.vmem %s304_s20, 48  ;;  %s417_s3 = scalar_lea.vmem %s304_s20, 64 }
  0x59   :  { %p414_p10 = scmp.ne.s32.totalorder %s304_s20, %s413_s21  ;;  %p418_p11 = scmp.lt.s32.totalorder %s304_s20, %s304_s20 }
  0x5a   :  { %v228_v58 = vsel %vm227_vm1, %v224_v54, %v226_v57  ;;  %p419_p12 = scmp.lt.s32.totalorder %s417_s3, %s413_s21 }
  0x5b   :  { %v231_v59 = vsel %vm229_vm2, %v230_v56, %v228_v58 }
  0x5c   :  { %v232_v60 = vadd.f32 0.01, %v231_v59  ;;  %240 = vst.msk [vmem:[#allocation10] sm:$0x7] %vm614_vm0, %v231_v59  ;;  %p420_p13 = por %p419_p12, %p418_p11 }
  0x5e   :  { %p421_p0 = pnand %p420_p13, %p414_p10 }
  0x60   :  { %424 = shalt.err (!%p421_p0)
}
  0x61   :  { %s425_s23 = scalar_lea.hbm %s726_s7, 48 }
  0x62   :  { %p426_p1 = scmp.ne.s32.totalorder %s726_s7, %s425_s23  ;;  %p429_p2 = scmp.lt.u32.totalorder %s425_s23, %s726_s7 }
  0x64   :  { %p431_p3 = pnand %p429_p2, %p426_p1 }
  0x66   :  { %434 = shalt.err (!%p431_p3)
}
  0x67   :  { %306 = dma.vmem_to_hbm [thread:$0]  %s304_s20, 48, %s726_s7, [#allocation11]   ;;  %345 = vrcp.f32 %v232_v60  ;;  %v242_v61 = vsub.f32 %v551_v1, %v622_v29  ;;  %v243_v62 = vsub.f32 %v553_v2, %v625_v30  ;;  %v244_v63 = vsub.f32 %v555_v3, %v628_v0 }
  0x68   :  { %s492_s30 = smov [#allocation12]   ;;  %s493_s5 = smov [#allocation6]  }
  0x69   :  { %s313_s9 = sshll.u32 %s492_s30, 4  ;;  %s273_s10 = sshll.u32 %s493_s5, 4  ;;  %s314_s9 = int_to_ptr.vmem [resolvable:$true] %s313_s9  ;;  %s274_s10 = int_to_ptr.vmem [resolvable:$true] %s273_s10 }
  0x6a   :  { %s435_s7 = scalar_lea.vmem %s314_s9, 48  ;;  %s439_s11 = scalar_lea.vmem %s314_s9, 64 }
  0x6b   :  { %p436_p4 = scmp.ne.s32.totalorder %s314_s9, %s435_s7  ;;  %p440_p5 = scmp.lt.s32.totalorder %s314_s9, %s314_s9 }
  0x6c   :  { %p441_p6 = scmp.lt.s32.totalorder %s439_s11, %s435_s7 }
  0x6e   :  { %p442_p7 = por %p441_p6, %p440_p5 }
  0x70   :  { %p443_p8 = pnand %p442_p7, %p436_p4 }
  0x71   :  { %v346_v4 = vpop.eup %345 }
  0x72   :  { %241 = vst.msk [vmem:[#allocation12] sm:$0x7] %vm614_vm0, %v346_v4  ;;  %v249_v5 = vrot.slane %v346_v4, %v570_v23  ;;  %v253_v6 = vrot.slane %v346_v4, %v572_v32  ;;  %v257_v7 = vrot.slane %v346_v4, %v574_v33 }
  0x73   :  { %446 = shalt.err (!%p443_p8)
}
  0x74   :  { %s447_s14 = scalar_lea.hbm %s727_s8, 48 }
  0x75   :  { %p448_p9 = scmp.ne.s32.totalorder %s727_s8, %s447_s14  ;;  %p451_p10 = scmp.lt.u32.totalorder %s447_s14, %s727_s8 }
  0x77   :  { %p453_p11 = pnand %p451_p10, %p448_p9 }
  0x79   :  { %456 = shalt.err (!%p453_p11)
}
  0x7a   :  { %316 = dma.vmem_to_hbm [thread:$0]  %s314_s9, 48, %s727_s8, [#allocation11]   ;;  %v261_v1 = vmul.f32 %v249_v5, %v242_v61  ;;  %v262_v2 = vmul.f32 %v253_v6, %v243_v62  ;;  %v263_v3 = vmul.f32 %v257_v7, %v244_v63 }
  0x7b   :  { %s457_s0 = scalar_lea.vmem %s274_s10, 384  ;;  %p462_p13 = scmp.lt.s32.totalorder %s274_s10, %s274_s10 }
  0x7c   :  { %264 = vst [vmem:[#allocation6] sm:$0xff] %v261_v1  ;;  %265 = vst [vmem:[#allocation6 + $0x8] sm:$0xff] %v262_v2  ;;  %p458_p12 = scmp.ne.s32.totalorder %s274_s10, %s457_s0  ;;  %p463_p0 = scmp.lt.s32.totalorder %s457_s0, %s457_s0 }
  0x7d   :  { %266 = vst [vmem:[#allocation6 + $0x10] sm:$0xff] %v263_v3 }
  0x7e   :  { %p464_p1 = por %p463_p0, %p462_p13 }
  0x80   :  { %p465_p2 = pnand %p464_p1, %p458_p12 }
  0x82   :  { %468 = shalt.err (!%p465_p2)
}
  0x83   :  { %s469_s21 = scalar_lea.hbm %s723_s4, 384 }
  0x84   :  { %p470_p3 = scmp.ne.s32.totalorder %s723_s4, %s469_s21  ;;  %p473_p4 = scmp.lt.u32.totalorder %s469_s21, %s723_s4 }
  0x86   :  { %p475_p5 = pnand %p473_p4, %p470_p3 }
  0x88   :  { %478 = shalt.err (!%p475_p5)
}
  0x89   :  { %276 = dma.vmem_to_hbm [thread:$0]  %s274_s10, 384, %s723_s4, [#allocation5]  }
  0x8a   :  { %481 = dma.done.wait [#allocation5], 384  }
  0x8b   :  { %482 = vsyncadd [#allocation5], 4294966912 }
  0x8c   :  { %483 = dma.done.wait [#allocation8], 96  }
  0x8d   :  { %484 = vsyncadd [#allocation8], 4294967200 }
  0x8e   :  { %485 = dma.done.wait [#allocation11], 96  }
  0x8f   :  { %486 = vsyncadd [#allocation11], 4294967200 }
  0x90   :  { %332 = vsyncpa [#allocation4], 1 }
  0x91   :  { %333 = vsyncpa [#allocation5], 1 }
  0x92   :  { %334 = vsyncpa [#allocation8], 1 }
  0x93   :  { %335 = vsyncpa [#allocation11], 1 }

</bundles_post_ra>
